<compile_context>
chip_gen: v7x
topology: tpu7x:2x2x1
jax: 0.10.0
libtpu: 0.0.40
codegen_flags: <defaults>
</compile_context>

<pallas_src>
import jax
import jax.numpy as jnp
from jax.experimental import pallas as pl
from jax.experimental.pallas import tpu as pltpu


def _make_reg_loss_kernel(K, C, HW):
    """One grid step == one batch element."""

    def kernel(ind_ref,    # VMEM (1, 1, K)  int32
               feat_ref,   # VMEM (1, C, HW) feature dtype (streamed slab)
               tgt_ref,    # VMEM (1, C, K)  f32
               mask_ref,   # VMEM (1, 1, K)  f32
               loss_ref,   # VMEM (1, 1, 1)  f32  partial smooth-L1 sum
               num_ref):   # VMEM (1, 1, 1)  f32  partial mask count
        feat = feat_ref[0]                       # (C, HW)
        ind_row = ind_ref[0]                     # (1, K) int32

        # One-hot gather on the MXU: onehot[hw, k] = (hw == ind[k]).
        iota_hw = jax.lax.broadcasted_iota(jnp.int32, (HW, K), 0)
        onehot = (iota_hw == ind_row).astype(feat.dtype)          # (HW, K)
        pred = jnp.dot(feat, onehot,
                       preferred_element_type=jnp.float32)        # (C, K)

        # Masked Smooth-L1 (beta = 1.0), reduction='sum'.
        m = mask_ref[0]                          # (1, K), 0/1
        r = pred * m                             # (C, K)
        t = tgt_ref[0] * m                       # (C, K)
        d = jnp.abs(r - t)
        sl1 = jnp.where(d < 1.0, 0.5 * d * d, d - 0.5)

        loss_ref[0] = jnp.sum(sl1, keepdims=True)   # (1, 1)
        num_ref[0] = jnp.sum(m, keepdims=True)      # (1, 1)

    return kernel


def reg_loss(output, mask, ind, target):
    """output: (B, C, H, W); mask: (B, K); ind: (B, K) int; target: (B, K, C)."""
    B, C, H, W = output.shape
    K = ind.shape[1]
    HW = H * W

    # Free view of NCHW -> (B, C, HW); the slab stays in its native layout and
    # is streamed per batch by BlockSpec (no wrapper transpose / cast of the
    # full feature map).
    feat = output.reshape(B, C, HW)

    # Small per-object tensors, made lane-dense on the K axis.
    ind3 = jnp.clip(ind.astype(jnp.int32), 0, HW - 1).reshape(B, 1, K)
    tgt = jnp.transpose(target.astype(jnp.float32), (0, 2, 1))     # (B, C, K)
    msk = mask.astype(jnp.float32).reshape(B, 1, K)

    kernel = _make_reg_loss_kernel(K, C, HW)

    itemsize = output.dtype.itemsize
    cost = pl.CostEstimate(
        flops=2 * B * C * HW * K,                 # one-hot gather matmuls
        transcendentals=0,
        bytes_accessed=(B * C * HW * itemsize     # feature slabs
                        + B * C * K * 4           # targets
                        + 2 * B * K * 4           # mask + ind
                        + 2 * B * 4))             # partial outputs

    part_loss, part_num = pl.pallas_call(
        kernel,
        out_shape=(jax.ShapeDtypeStruct((B, 1, 1), jnp.float32),
                   jax.ShapeDtypeStruct((B, 1, 1), jnp.float32)),
        grid_spec=pltpu.PrefetchScalarGridSpec(
            num_scalar_prefetch=0,
            grid=(B,),
            in_specs=[
                pl.BlockSpec((1, 1, K), lambda b: (b, 0, 0)),    # ind
                pl.BlockSpec((1, C, HW), lambda b: (b, 0, 0)),   # feature slab
                pl.BlockSpec((1, C, K), lambda b: (b, 0, 0)),    # target
                pl.BlockSpec((1, 1, K), lambda b: (b, 0, 0)),    # mask
            ],
            out_specs=(pl.BlockSpec((1, 1, 1), lambda b: (b, 0, 0)),
                       pl.BlockSpec((1, 1, 1), lambda b: (b, 0, 0))),
        ),
        compiler_params=pltpu.CompilerParams(
            dimension_semantics=("parallel",)),
        cost_estimate=cost,
    )(ind3, feat, tgt, msk)

    return jnp.sum(part_loss) / (jnp.sum(part_num) + 0.0001)


def reg_loss_reference(output, mask, ind, target):
    """Pure-JAX reference mirroring the PyTorch module."""
    B, C, H, W = output.shape
    feat = jnp.transpose(output, (0, 2, 3, 1)).reshape(B, H * W, C)
    pred = jnp.take_along_axis(feat, ind.astype(jnp.int32)[..., None], axis=1)
    num = jnp.sum(mask.astype(jnp.float32))
    m = mask.astype(jnp.float32)[..., None]
    r = pred * m
    g = target * m
    d = jnp.abs(r - g)
    sl1 = jnp.where(d < 1.0, 0.5 * d * d, d - 0.5)
    return jnp.sum(sl1) / (num + 0.0001)


if __name__ == "__main__":
    B, C, H, W, K = 2, 4, 16, 16, 8
    key = jax.random.PRNGKey(0)
    k1, k2, k3, k4 = jax.random.split(key, 4)

    output = jax.random.normal(k1, (B, C, H, W), dtype=jnp.float32)
    ind = jax.random.randint(k2, (B, K), 0, H * W, dtype=jnp.int32)
    mask = (jax.random.uniform(k3, (B, K)) > 0.3).astype(jnp.float32)
    target = jax.random.normal(k4, (B, K, C), dtype=jnp.float32) * 2.0

    loss = reg_loss(output, mask, ind, target)
    jax.block_until_ready(loss)

    ref = reg_loss_reference(output, mask, ind, target)
    assert jnp.allclose(loss, ref, atol=1e-5, rtol=1e-5), (loss, ref)

    print("KERNEL_OK")
</pallas_src>

<mosaic_0001>
module attributes {stable_mosaic.version = 11 : i64} {
  func.func @kernel(%arg0: i32, %arg1: memref<1x1x8xi32, #tpu.memory_space<vmem>>, %arg2: memref<1x4x256xf32, #tpu.memory_space<vmem>>, %arg3: memref<1x4x8xf32, #tpu.memory_space<vmem>>, %arg4: memref<1x1x8xf32, #tpu.memory_space<vmem>>, %arg5: memref<1x1x1xf32, #tpu.memory_space<vmem>>, %arg6: memref<1x1x1xf32, #tpu.memory_space<vmem>>) attributes {dimension_semantics = [#tpu.dimension_semantics<parallel>], iteration_bounds = array<i64: 2>, scalar_prefetch = 0 : i64, scratch_operands = 0 : i64, tpu.core_type = #tpu.core_type<tc>, window_params = [{transform_indices = @transform_0, window_bounds = array<i64: 1, 1, 8>}, {transform_indices = @transform_1, window_bounds = array<i64: 1, 4, 256>}, {transform_indices = @transform_2, window_bounds = array<i64: 1, 4, 8>}, {transform_indices = @transform_3, window_bounds = array<i64: 1, 1, 8>}, {transform_indices = @transform_4, window_bounds = array<i64: 1, 1, 1>}, {transform_indices = @transform_5, window_bounds = array<i64: 1, 1, 1>}]} {
    %c0 = arith.constant 0 : index
    %c0_0 = arith.constant 0 : index
    %c0_1 = arith.constant 0 : index
    %0 = vector.load %arg2[%c0, %c0_0, %c0_1] : memref<1x4x256xf32, #tpu.memory_space<vmem>>, vector<1x4x256xf32>
    %1 = vector.shape_cast %0 : vector<1x4x256xf32> to vector<4x256xf32>
    %c0_2 = arith.constant 0 : index
    %c0_3 = arith.constant 0 : index
    %c0_4 = arith.constant 0 : index
    %2 = vector.load %arg1[%c0_2, %c0_3, %c0_4] : memref<1x1x8xi32, #tpu.memory_space<vmem>>, vector<1x1x8xi32>
    %3 = vector.shape_cast %2 : vector<1x1x8xi32> to vector<1x8xi32>
    %4 = tpu.iota {dimensions = array<i32: 0>} : vector<256x8xi32>
    %5 = vector.broadcast %3 : vector<1x8xi32> to vector<256x8xi32>
    %6 = arith.cmpi eq, %4, %5 : vector<256x8xi32>
    %7 = arith.extui %6 : vector<256x8xi1> to vector<256x8xi32>
    %8 = arith.sitofp %7 : vector<256x8xi32> to vector<256x8xf32>
    %cst = arith.constant dense<0.000000e+00> : vector<4x8xf32>
    %9 = tpu.matmul %1, %8, %cst {dimension_numbers = #tpu.dot_dimension_numbers<[1], [0], [0], [1], [0, 0, 1, 1], [], []>} : vector<4x256xf32>, vector<256x8xf32>, vector<4x8xf32> -> vector<4x8xf32>
    %c0_5 = arith.constant 0 : index
    %c0_6 = arith.constant 0 : index
    %c0_7 = arith.constant 0 : index
    %10 = vector.load %arg4[%c0_5, %c0_6, %c0_7] : memref<1x1x8xf32, #tpu.memory_space<vmem>>, vector<1x1x8xf32>
    %11 = vector.shape_cast %10 : vector<1x1x8xf32> to vector<1x8xf32>
    %12 = vector.broadcast %11 : vector<1x8xf32> to vector<4x8xf32>
    %13 = arith.mulf %9, %12 : vector<4x8xf32>
    %c0_8 = arith.constant 0 : index
    %c0_9 = arith.constant 0 : index
    %c0_10 = arith.constant 0 : index
    %14 = vector.load %arg3[%c0_8, %c0_9, %c0_10] : memref<1x4x8xf32, #tpu.memory_space<vmem>>, vector<1x4x8xf32>
    %15 = vector.shape_cast %14 : vector<1x4x8xf32> to vector<4x8xf32>
    %16 = vector.broadcast %11 : vector<1x8xf32> to vector<4x8xf32>
    %17 = arith.mulf %15, %16 : vector<4x8xf32>
    %18 = arith.subf %13, %17 : vector<4x8xf32>
    %19 = math.absf %18 : vector<4x8xf32>
    %cst_11 = arith.constant 1.000000e+00 : f32
    %20 = vector.broadcast %cst_11 : f32 to vector<4x8xf32>
    %21 = arith.cmpf olt, %19, %20 : vector<4x8xf32>
    %cst_12 = arith.constant 5.000000e-01 : f32
    %22 = vector.broadcast %cst_12 : f32 to vector<4x8xf32>
    %23 = arith.mulf %22, %19 : vector<4x8xf32>
    %24 = arith.mulf %23, %19 : vector<4x8xf32>
    %cst_13 = arith.constant 5.000000e-01 : f32
    %25 = vector.broadcast %cst_13 : f32 to vector<4x8xf32>
    %26 = arith.subf %19, %25 : vector<4x8xf32>
    %27 = arith.select %21, %24, %26 : vector<4x8xi1>, vector<4x8xf32>
    %28 = vector.shape_cast %27 : vector<4x8xf32> to vector<1x4x8xf32>
    %cst_14 = arith.constant dense<0.000000e+00> : vector<1xf32>
    %29 = vector.multi_reduction <add>, %28, %cst_14 [1, 2] : vector<1x4x8xf32> to vector<1xf32>
    %30 = vector.shape_cast %29 : vector<1xf32> to vector<1x1x1xf32>
    %31 = vector.extract %30[0, 0, 0] : f32 from vector<1x1x1xf32>
    %32 = vector.broadcast %31 : f32 to vector<1x1xf32>
    %c0_15 = arith.constant 0 : index
    %c0_16 = arith.constant 0 : index
    %c0_17 = arith.constant 0 : index
    %33 = vector.load %arg5[%c0_15, %c0_16, %c0_17] : memref<1x1x1xf32, #tpu.memory_space<vmem>>, vector<1x1x1xf32>
    %34 = vector.shape_cast %33 : vector<1x1x1xf32> to vector<1x1xf32>
    %35 = vector.shape_cast %32 : vector<1x1xf32> to vector<1x1x1xf32>
    tpu.vector_store %arg5[%c0_15, %c0_16, %c0_17], %35 {strides = array<i32>} : memref<1x1x1xf32, #tpu.memory_space<vmem>>, vector<1x1x1xf32>,
    %36 = vector.shape_cast %11 : vector<1x8xf32> to vector<1x1x8xf32>
    %cst_18 = arith.constant dense<0.000000e+00> : vector<1xf32>
    %37 = vector.multi_reduction <add>, %36, %cst_18 [1, 2] : vector<1x1x8xf32> to vector<1xf32>
    %38 = vector.shape_cast %37 : vector<1xf32> to vector<1x1x1xf32>
    %39 = vector.extract %38[0, 0, 0] : f32 from vector<1x1x1xf32>
    %40 = vector.broadcast %39 : f32 to vector<1x1xf32>
    %c0_19 = arith.constant 0 : index
    %c0_20 = arith.constant 0 : index
    %c0_21 = arith.constant 0 : index
    %41 = vector.load %arg6[%c0_19, %c0_20, %c0_21] : memref<1x1x1xf32, #tpu.memory_space<vmem>>, vector<1x1x1xf32>
    %42 = vector.shape_cast %41 : vector<1x1x1xf32> to vector<1x1xf32>
    %43 = vector.shape_cast %40 : vector<1x1xf32> to vector<1x1x1xf32>
    tpu.vector_store %arg6[%c0_19, %c0_20, %c0_21], %43 {strides = array<i32>} : memref<1x1x1xf32, #tpu.memory_space<vmem>>, vector<1x1x1xf32>,
    return
  }
  func.func @transform_0(%arg0: i32) -> (i32, i32, i32) {
    %c0_i32 = arith.constant 0 : i32
    %c0_i32_0 = arith.constant 0 : i32
    %c0_i32_1 = arith.constant 0 : i32
    return %arg0, %c0_i32, %c0_i32_0 : i32, i32, i32
  }
  func.func @transform_1(%arg0: i32) -> (i32, i32, i32) {
    %c0_i32 = arith.constant 0 : i32
    %c0_i32_0 = arith.constant 0 : i32
    %c0_i32_1 = arith.constant 0 : i32
    return %arg0, %c0_i32, %c0_i32_0 : i32, i32, i32
  }
  func.func @transform_2(%arg0: i32) -> (i32, i32, i32) {
    %c0_i32 = arith.constant 0 : i32
    %c0_i32_0 = arith.constant 0 : i32
    %c0_i32_1 = arith.constant 0 : i32
    return %arg0, %c0_i32, %c0_i32_0 : i32, i32, i32
  }
  func.func @transform_3(%arg0: i32) -> (i32, i32, i32) {
    %c0_i32 = arith.constant 0 : i32
    %c0_i32_0 = arith.constant 0 : i32
    %c0_i32_1 = arith.constant 0 : i32
    return %arg0, %c0_i32, %c0_i32_0 : i32, i32, i32
  }
  func.func @transform_4(%arg0: i32) -> (i32, i32, i32) {
    %c0_i32 = arith.constant 0 : i32
    %c0_i32_0 = arith.constant 0 : i32
    %c0_i32_1 = arith.constant 0 : i32
    return %arg0, %c0_i32, %c0_i32_0 : i32, i32, i32
  }
  func.func @transform_5(%arg0: i32) -> (i32, i32, i32) {
    %c0_i32 = arith.constant 0 : i32
    %c0_i32_0 = arith.constant 0 : i32
    %c0_i32_1 = arith.constant 0 : i32
    return %arg0, %c0_i32, %c0_i32_0 : i32, i32, i32
  }
}

</mosaic_0001>

<bundles_post_ra>
// kernel: tpu_custom_call.1
= control target key start
LH: loop header
LB: loop body
LE: loop exit
PB: predicated region body
PF: predicated region fallthrough
CT: control target
= control target key end

     0   :  { %11 = vsyncpa [#allocation3], 0  ;;  %s1368_s0 = inlined_call_operand.hbm [shape: s32[2,1,8], index: 0, kind: input, shape index: {}]   ;;  %s1369_s1 = inlined_call_operand.hbm [shape: f32[2,4,256], index: 1, kind: input, shape index: {}]   ;;  %s1370_s2 = inlined_call_operand.hbm [shape: f32[2,4,8], index: 2, kind: input, shape index: {}]   ;;  %s1371_s3 = inlined_call_operand.vmem [shape: f32[2,1,8], index: 3, kind: input, shape index: {}]   ;;  %s1372_s4 = inlined_call_operand.vmem [shape: f32[2,1,1], index: 4, kind: output, shape index: {0}]   ;;  %s1373_s5 = inlined_call_operand.vmem [shape: f32[2,1,1], index: 5, kind: output, shape index: {1}]  }
   0x1   :  { %13 = vsyncpa [#allocation3 + $0x1], 0 }
   0x2   :  { %14 = vsyncpa [#allocation5], 0 }
   0x3   :  { %16 = vsyncpa [#allocation5 + $0x1], 0  ;;  %s1082_s18 = smov 0   ;;  %s1084_s19 = smov 0  }
   0x4   :  { %s1086_s20 = smov 0   ;;  %s1088_s21 = smov 0  }
   0x5 LB: > { %s1101_s22 = sadd.s32 4294967295, %s1046_s21   ;;  %s1104_s23 = sadd.s32 1, %s1046_s21   ;;  %s1046_s21 = sphi %s1088_s21, %s1386_s21   ;;  %s1042_s20 = sphi %s1086_s20, %s1385_s20   ;;  %s1038_s19 = sphi %s1084_s19, %s1384_s19   ;;  %s1034_s18 = sphi %s1082_s18, %s1383_s18  }
   0x6   : > { %s26_s24 = ssub.s32 %s1046_s21, %s1104_s23  ;;  %s29_s25 = sadd.s32 1, %s1042_s20 }
   0x7   : > { %p27_p0 = scmp.eq.s32.totalorder %s26_s24, 0  ;;  %p36_p1 = scmp.ne.s32.totalorder %s1042_s20, %s1038_s19 }
   0x8   : > { %p37_p2 = scmp.eq.s32.totalorder %s1046_s21, 0  ;;  %p42_p3 = scmp.ne.s32.totalorder %s1038_s19, %s1034_s18 }
   0x9   : > { %s1114_s26 = scalar_select %p27_p0, %s1042_s20, %s29_s25  }
   0xa   : > { %p38_p4 = por %p37_p2, %p36_p1  ;;  %p43_p5 = scmp.eq.s32.totalorder %s1101_s22, 0 }
   0xb   : > { %p883_p6 = scmp.lt.s32.totalorder %s1046_s21, 2  ;;  %s1123_s28 = sand.u32 1, %s1042_s20  }
   0xc   : > { %p1118_p7 = por %p43_p5, %p42_p3  ;;  %s213_s30 = sand.u32 1, %s1046_s21  }
   0xd   : > { %p1125_p8 = pnand %p883_p6, %p38_p4  ;;  %s719_s6 = sshll.u32 %s1123_s28, 3 }
   0xe   : > { %s1376_s27 = scalar_select %p1118_p7, 1, 0 }
   0xf   : > { %s1377_s29 = scalar_select %p1125_p8, 1, 0 }
  0x10   : > { %s795_s7 = sshll.u32 %s1046_s21, 7  ;;  %s217_s8 = scalar_lea.vmem [#allocation4], %s719_s6 }
  0x11   : > { %s225_s9 = sshll.u32 %s217_s8, 4  ;;  %s1135_s12 = scalar_lea.hbm %s1369_s1, %s795_s7  ;;  %s1137_s9 = int_to_ptr.vmem [resolvable:$true] %s225_s9 }
  0x12   : > { %s1139_s13 = scalar_lea.sflag [#allocation5], %s213_s30  ;;  %s918_s14 = scalar_lea.hbm %s1135_s12, 128 }
  0x13   : > { %p919_p9 = scmp.ne.s32.totalorder %s1135_s12, %s918_s14  ;;  %p1145_p10 = pneg %p1125_p8 }
  0x14   : > { %s923_s18 = scalar_lea.hbm %s1369_s1, 256  ;;  %p924_p13 = scmp.lt.u32.totalorder %s1135_s12, %s1369_s1 }
  0x15   : > { %p921_p11 = pnand %p1145_p10, %p919_p9  ;;  %p925_p0 = scmp.lt.u32.totalorder %s923_s18, %s918_s14 }
  0x16   : > { %p927_p2 = scmp.lt.u32.totalorder %s918_s14, %s1135_s12 }
  0x17   : > { %p922_p12 = pneg %p921_p11  ;;  %p926_p1 = por %p925_p0, %p924_p13 }
  0x19   : > { %p928_p3 = por %p927_p2, %p926_p1 }
  0x1b   : > { %p929_p4 = pnand %p928_p3, %p922_p12 }
  0x1d   : > { %932 = shalt.err (!%p929_p4)
}
  0x1e   : > { %s933_s30 = scalar_lea.vmem %s1137_s9, 128  ;;  %s1048_s6 = smov [#allocation4]  }
  0x1f   : > { %p934_p5 = scmp.ne.s32.totalorder %s1137_s9, %s933_s30  ;;  %s938_s7 = sshll.u32 %s1048_s6, 4  ;;  %s939_s7 = int_to_ptr.vmem [resolvable:$false] %s938_s7 }
  0x20   : > { %s940_s8 = scalar_lea.vmem %s939_s7, 256  ;;  %p941_p11 = scmp.lt.s32.totalorder %s1137_s9, %s939_s7 }
  0x21   : > { %p936_p6 = pnand %p934_p5, %p1145_p10  ;;  %p942_p7 = scmp.lt.s32.totalorder %s940_s8, %s933_s30 }
  0x23   : > { %p937_p9 = pneg %p936_p6  ;;  %p943_p13 = por %p942_p7, %p941_p11 }
  0x25   : > { %p944_p0 = pnand %p943_p13, %p937_p9 }
  0x27   : > { %947 = shalt.err (!%p944_p0)
}
  0x28   : > { %879 = dma.hbm_to_vmem [thread:$0]  (!%p1125_p8), %s1135_s12, 128, %s1137_s9, %s1139_s13  }
  0x29   : > { %p724_p12 = scmp.ge.s32.totalorder %s1046_s21, 1  ;;  %p254_p1 = scmp.lt.s32.totalorder %s1046_s21, 3 }
  0x2a   : > { %s718_s11 = sshll.u32 %s1046_s21, 4  ;;  %s199_s18 = scalar_lea.vmem [#allocation2], %s1123_s28 }
  0x2b   : > { %p1171_p2 = pnand %p724_p12, %p254_p1  ;;  %s1179_s17 = scalar_lea.hbm %s1368_s0, %s718_s11 }
  0x2c   : > { %s206_s24 = sshll.u32 %s199_s18, 4  ;;  %s722_s9 = sshll.u32 %s1123_s28, 2  ;;  %s1182_s24 = int_to_ptr.vmem [resolvable:$true] %s206_s24 }
  0x2d   : > { %s1379_s10 = scalar_select %p1171_p2, 1, 0 }
  0x2e   : > { %s197_s12 = scalar_lea.sflag [#allocation3], %s1123_s28  ;;  %s948_s25 = scalar_lea.hbm %s1179_s17, 16 }
  0x2f   : > { %p949_p7 = scmp.ne.s32.totalorder %s1179_s17, %s948_s25  ;;  %s953_s7 = scalar_lea.hbm %s1368_s0, 32 }
  0x30   : > { %p954_p5 = scmp.lt.u32.totalorder %s1179_s17, %s1368_s0  ;;  %p955_p6 = scmp.lt.u32.totalorder %s953_s7, %s948_s25 }
  0x31   : > { %p951_p3 = pnand %p949_p7, %p1145_p10  ;;  %p957_p11 = scmp.lt.u32.totalorder %s948_s25, %s1179_s17 }
  0x32   : > { %p956_p9 = por %p955_p6, %p954_p5 }
  0x33   : > { %p952_p4 = pneg %p951_p3 }
  0x34   : > { %p958_p13 = por %p957_p11, %p956_p9 }
  0x36   : > { %p959_p0 = pnand %p958_p13, %p952_p4 }
  0x38   : > { %962 = shalt.err (!%p959_p0)
}
  0x39   : > { %s963_s14 = scalar_lea.vmem %s1182_s24, 16  ;;  %s1049_s16 = smov [#allocation2]  }
  0x3a   : > { %p964_p12 = scmp.ne.s32.totalorder %s1182_s24, %s963_s14  ;;  %s968_s18 = sshll.u32 %s1049_s16, 4  ;;  %s969_s18 = int_to_ptr.vmem [resolvable:$false] %s968_s18 }
  0x3b   : > { %s970_s30 = scalar_lea.vmem %s969_s18, 32  ;;  %p971_p3 = scmp.lt.s32.totalorder %s1182_s24, %s969_s18 }
  0x3c   : > { %p966_p1 = pnand %p964_p12, %p1145_p10  ;;  %p972_p2 = scmp.lt.s32.totalorder %s970_s30, %s963_s14 }
  0x3e   : > { %p967_p7 = pneg %p966_p1  ;;  %p973_p5 = por %p972_p2, %p971_p3 }
  0x40   : > { %p974_p6 = pnand %p973_p5, %p967_p7 }
  0x42   : > { %977 = shalt.err (!%p974_p6)
}
  0x43   : > { %876 = dma.hbm_to_vmem [thread:$0]  (!%p1125_p8), %s1179_s17, 16, %s1182_s24, %s197_s12  }
  0x44   : > { %s723_s25 = sshll.u32 %s1046_s21, 6  ;;  %s236_s11 = scalar_lea.vmem [#allocation6], %s722_s9 }
  0x45   : > { %s1211_s8 = scalar_lea.hbm %s1370_s2, %s723_s25  ;;  %s243_s14 = sshll.u32 %s236_s11, 4  ;;  %s244_s14 = int_to_ptr.vmem [resolvable:$true] %s243_s14 }
  0x46   : > { %s978_s16 = scalar_lea.hbm %s1211_s8, 64  ;;  %s983_s24 = scalar_lea.hbm %s1370_s2, 128 }
  0x47   : > { %p979_p2 = scmp.ne.s32.totalorder %s1211_s8, %s978_s16  ;;  %p984_p11 = scmp.lt.u32.totalorder %s1211_s8, %s1370_s2 }
  0x48   : > { %p985_p13 = scmp.lt.u32.totalorder %s983_s24, %s978_s16  ;;  %p987_p12 = scmp.lt.u32.totalorder %s978_s16, %s1211_s8 }
  0x49   : > { %p981_p4 = pnand %p979_p2, %p1145_p10 }
  0x4a   : > { %p986_p0 = por %p985_p13, %p984_p11 }
  0x4b   : > { %p982_p9 = pneg %p981_p4 }
  0x4c   : > { %p988_p1 = por %p987_p12, %p986_p0 }
  0x4e   : > { %p989_p7 = pnand %p988_p1, %p982_p9 }
  0x50   : > { %992 = shalt.err (!%p989_p7)
}
  0x51   : > { %s993_s28 = scalar_lea.vmem %s244_s14, 64  ;;  %s1050_s9 = smov [#allocation6]  }
  0x52   : > { %p994_p3 = scmp.ne.s32.totalorder %s244_s14, %s993_s28  ;;  %s998_s30 = sshll.u32 %s1050_s9, 4  ;;  %s999_s30 = int_to_ptr.vmem [resolvable:$false] %s998_s30 }
  0x53   : > { %s1000_s25 = scalar_lea.vmem %s999_s30, 128  ;;  %p1001_p2 = scmp.lt.s32.totalorder %s244_s14, %s999_s30 }
  0x54   : > { %p996_p5 = pnand %p994_p3, %p1145_p10  ;;  %p1002_p4 = scmp.lt.s32.totalorder %s1000_s25, %s993_s28 }
  0x56   : > { %p997_p6 = pneg %p996_p5  ;;  %p1003_p8 = por %p1002_p4, %p1001_p2 }
  0x58   : > { %p1004_p11 = pnand %p1003_p8, %p997_p6 }
  0x5a   : > { %1007 = shalt.err (!%p1004_p11)
}
  0x5b   : > { %p1380_p13 = scmp.ne.s32.totalorder %s1377_s29, 0  ;;  %p1381_p9 = scmp.ne.s32.totalorder %s1379_s10, 0 }
  0x5c   : > { %s1236_s15 = sand.u32 (!%p1381_p9), 1, %s1038_s19   ;;  %p1382_p10 = scmp.ne.s32.totalorder (!%p1381_p9), %s1376_s27, 0 }
  0x5d   : > { %882 = dma.hbm_to_vmem [thread:$0]  (!%p1380_p13), %s1211_s8, 64, %s244_s14, %s1139_s13  }
  0x5e   : > { %258 = sbr.rel (%p1381_p9) target bundleno = 583 (0x247), region = 36  ;;  %s261_s6 = scalar_lea.sflag (!%p1381_p9), [#allocation3], %s1236_s15 }
  0x5f   : > { %s263_s7 = scalar_lea.vmem (!%p1381_p9), [#allocation2], %s1236_s15 }
  0x65   : > { %1025 = dma.done.wait (%p1382_p10), %s261_s6, 16  }
  0x66   : > { %1027 = vsyncadd (%p1382_p10), %s261_s6, 4294967280  ;;  %s268_s29 = sand.u32 1, %s1101_s22   ;;  %s725_s13 = sshll.u32 %s1236_s15, 3 }
  0x67   : > { %s269_s10 = scalar_lea.sflag [#allocation5], %s268_s29  ;;  %s1246_s8 = scalar_lea.vmem [#allocation4], %s725_s13 }
  0x68   : > { %1029 = dma.done.wait (%p1382_p10), %s269_s10, 192  }
  0x69   : > { %1031 = vsyncadd (%p1382_p10), %s269_s10, 4294967104  ;;  %v332_v0 = vlaneseq  ;;  %v1263_v11 = vld [vmem:[%s263_s7] ss:$0 sm:$0xff]  ;;  %v1051_v14 = vmov 1.0|1.0   ;;  %v330_v21 = vld [vmem:[%s1246_s8] sm:$0xff] }
  0x6a   : > { %v466_v26 = vcombine.high %v330_v21, %v330_v21  ;;  %p321_p8 = scmp.lt.s32.totalorder %s1101_s22, 1  ;;  %s726_s16 = sshll.u32 %s1236_s15, 2 }
  0x6b   : > { %v1252_v1 = vshrl.u32 %v332_v0, 7  ;;  %s281_s17 = scalar_lea.vmem [#allocation6], %s726_s16 }
  0x6c   : > { %532 = vmatprep.mubr.f32.mxu0 %v466_v26  ;;  %s1388_s22 = smov (!%p321_p8, %s1101_s22), 1  ;;  %v546_v40 = vld [vmem:[%s281_s17] sm:$0xf] }
  0x6d   : > { %v349_v2 = vadd.s32 128, %v1252_v1  ;;  %v350_v3 = vadd.s32 136, %v1252_v1  ;;  %v334_v4 = vadd.s32 8, %v1252_v1  ;;  %v351_v5 = vadd.s32 144, %v1252_v1  ;;  %s323_s14 = scalar_lea.vmem %s1371_s3, %s1388_s22  ;;  %s326_s12 = scalar_lea.vmem %s1372_s4, %s1388_s22 }
  0x6e   : > { %v352_v6 = vadd.s32 152, %v1252_v1  ;;  %v335_v7 = vadd.s32 16, %v1252_v1  ;;  %v336_v8 = vadd.s32 24, %v1252_v1  ;;  %v353_v9 = vadd.s32 160, %v1252_v1  ;;  %v538_v38 = vld [vmem:[%s323_s14] sm:$0x1]  ;;  %s329_s30 = scalar_lea.vmem %s1373_s5, %s1388_s22 }
  0x6f   : > { %v354_v10 = vadd.s32 168, %v1252_v1  ;;  %v337_v12 = vadd.s32 32, %v1252_v1  ;;  %v338_v13 = vadd.s32 40, %v1252_v1  ;;  %vm385_vm0 = vcmp.eq.s32.totalorder %v349_v2, %v1263_v11 }
  0x70   : > { %vm386_vm1 = vcmp.eq.s32.totalorder %v350_v3, %v1263_v11  ;;  %vm369_vm2 = vcmp.eq.s32.totalorder %v1252_v1, %v1263_v11  ;;  %vm370_vm3 = vcmp.eq.s32.totalorder %v334_v4, %v1263_v11  ;;  %vm387_vm5 = vcmp.eq.s32.totalorder %v351_v5, %v1263_v11 }
  0x71   : > { %vm831_vm4 = vmpackc.low %vm386_vm1, %vm385_vm0  ;;  %vm388_vm6 = vcmp.eq.s32.totalorder %v352_v6, %v1263_v11  ;;  %vm371_vm7 = vcmp.eq.s32.totalorder %v335_v7, %v1263_v11  ;;  %vm372_vm8 = vcmp.eq.s32.totalorder %v336_v8, %v1263_v11  ;;  %vm389_vm10 = vcmp.eq.s32.totalorder %v353_v9, %v1263_v11 }
  0x72   : > { %832 = vmatprep.subr.msk.bf16.mxu0 %vm831_vm4, %v1051_v14  ;;  %vm833_vm9 = vmpackc.low %vm370_vm3, %vm369_vm2  ;;  %vm390_vm11 = vcmp.eq.s32.totalorder %v354_v10, %v1263_v11  ;;  %v355_v15 = vadd.s32 176, %v1252_v1  ;;  %v356_v16 = vadd.s32 184, %v1252_v1  ;;  %v339_v17 = vadd.s32 48, %v1252_v1 }
  0x73   : > { %834 = vmatpush3.bf16.msk.msra.mxu0 %vm833_vm9, %v1051_v14  ;;  %vm835_vm12 = vmpackc.low %vm388_vm6, %vm387_vm5  ;;  %vm373_vm15 = vcmp.eq.s32.totalorder %v337_v12, %v1263_v11  ;;  %vm374_vm0 = vcmp.eq.s32.totalorder %v338_v13, %v1263_v11  ;;  %v340_v18 = vadd.s32 56, %v1252_v1  ;;  %v357_v19 = vadd.s32 192, %v1252_v1 }
  0x74   : > { %836 = vmatprep.subr.msk.bf16.mxu0 %vm835_vm12, %v1051_v14  ;;  %vm837_vm13 = vmpackc.low %vm372_vm8, %vm371_vm7  ;;  %vm391_vm1 = vcmp.eq.s32.totalorder %v355_v15, %v1263_v11  ;;  %vm392_vm2 = vcmp.eq.s32.totalorder %v356_v16, %v1263_v11  ;;  %v358_v20 = vadd.s32 200, %v1252_v1  ;;  %vm375_vm4 = vcmp.eq.s32.totalorder %v339_v17, %v1263_v11 }
  0x75   : > { %vm839_vm14 = vmpackc.low %vm390_vm11, %vm389_vm10  ;;  %vm376_vm6 = vcmp.eq.s32.totalorder %v340_v18, %v1263_v11  ;;  %vm393_vm7 = vcmp.eq.s32.totalorder %v357_v19, %v1263_v11  ;;  %v341_v22 = vadd.s32 64, %v1252_v1  ;;  %v342_v23 = vadd.s32 72, %v1252_v1 }
  0x76   : > { %vm841_vm3 = vmpackc.low %vm374_vm0, %vm373_vm15  ;;  %vm394_vm8 = vcmp.eq.s32.totalorder %v358_v20, %v1263_v11  ;;  %v359_v24 = vadd.s32 208, %v1252_v1  ;;  %v360_v25 = vadd.s32 216, %v1252_v1  ;;  %v343_v27 = vadd.s32 80, %v1252_v1 }
  0x77   : > { %838 = vmatpush3.bf16.msk.msra.mxu0 %vm837_vm13, %v1051_v14  ;;  %vm843_vm5 = vmpackc.low %vm392_vm2, %vm391_vm1  ;;  %vm377_vm11 = vcmp.eq.s32.totalorder %v341_v22, %v1263_v11  ;;  %vm378_vm12 = vcmp.eq.s32.totalorder %v342_v23, %v1263_v11  ;;  %v344_v28 = vadd.s32 88, %v1252_v1  ;;  %v361_v29 = vadd.s32 224, %v1252_v1 }
  0x78   : > { %840 = vmatprep.subr.msk.bf16.mxu0 %vm839_vm14, %v1051_v14  ;;  %vm845_vm9 = vmpackc.low %vm376_vm6, %vm375_vm4  ;;  %vm395_vm13 = vcmp.eq.s32.totalorder %v359_v24, %v1263_v11  ;;  %vm396_vm14 = vcmp.eq.s32.totalorder %v360_v25, %v1263_v11  ;;  %v362_v30 = vadd.s32 232, %v1252_v1  ;;  %vm379_vm1 = vcmp.eq.s32.totalorder %v343_v27, %v1263_v11 }
  0x79   : > { %vm847_vm10 = vmpackc.low %vm394_vm8, %vm393_vm7  ;;  %vm380_vm2 = vcmp.eq.s32.totalorder %v344_v28, %v1263_v11  ;;  %v345_v31 = vadd.s32 96, %v1252_v1  ;;  %v346_v32 = vadd.s32 104, %v1252_v1  ;;  %v363_v33 = vadd.s32 240, %v1252_v1 }
  0x7a   : > { %vm849_vm15 = vmpackc.low %vm378_vm12, %vm377_vm11  ;;  %vm398_vm4 = vcmp.eq.s32.totalorder %v362_v30, %v1263_v11  ;;  %v364_v34 = vadd.s32 248, %v1252_v1  ;;  %v347_v35 = vadd.s32 112, %v1252_v1  ;;  %v348_v36 = vadd.s32 120, %v1252_v1 }
  0x7b   : > { %842 = vmatpush3.bf16.msk.msra.mxu0 %vm841_vm3, %v1051_v14  ;;  %vm851_vm0 = vmpackc.low %vm396_vm14, %vm395_vm13  ;;  %vm397_vm3 = vcmp.eq.s32.totalorder %v361_v29, %v1263_v11  ;;  %vm381_vm7 = vcmp.eq.s32.totalorder %v345_v31, %v1263_v11  ;;  %vm382_vm8 = vcmp.eq.s32.totalorder %v346_v32, %v1263_v11  ;;  %v542_v37 = vsub.s32 0, %v1252_v1 }
  0x7c   : > { %844 = vmatprep.subr.msk.bf16.mxu0 %vm843_vm5, %v1051_v14  ;;  %vm853_vm5 = vmpackc.low %vm380_vm2, %vm379_vm1  ;;  %vm383_vm13 = vcmp.eq.s32.totalorder %v347_v35, %v1263_v11  ;;  %vm384_vm14 = vcmp.eq.s32.totalorder %v348_v36, %v1263_v11  ;;  %vm569_vm2 = vcmask 57344  }
  0x7d   : > { %vm855_vm6 = vmpackc.low %vm398_vm4, %vm397_vm3  ;;  %v543_v39 = vrot.slane %v538_v38, %v542_v37  ;;  %v570_v53 = vsel %vm569_vm2, %v538_v38, 0.0  ;;  %vm567_vm3 = vcmask 0  }
  0x7e   : > { %vm857_vm11 = vmpackc.low %vm382_vm8, %vm381_vm7 }
  0x7f   : > { %846 = vmatpush3.bf16.msk.msra.mxu0 %vm845_vm9, %v1051_v14  ;;  %vm399_vm9 = vcmp.eq.s32.totalorder %v363_v33, %v1263_v11  ;;  %v547_v44 = vmul.f32 %v546_v40, %v543_v39 }
  0x80   : > { %848 = vmatprep.subr.msk.bf16.mxu0 %vm847_vm10, %v1051_v14  ;;  %vm400_vm10 = vcmp.eq.s32.totalorder %v364_v34, %v1263_v11 }
  0x81   : > { %vm859_vm12 = vmpackc.low %vm400_vm10, %vm399_vm9 }
  0x83   : > { %850 = vmatpush3.bf16.msk.msra.mxu0 %vm849_vm15, %v1051_v14  ;;  %vm861_vm15 = vmpackc.low %vm384_vm14, %vm383_vm13 }
  0x84   : > { %852 = vmatprep.subr.msk.bf16.mxu0 %vm851_vm0, %v1051_v14  ;;  %vm555_vm0 = vcmask 60416  }
  0x87   : > { %854 = vmatpush3.bf16.msk.msra.mxu0 %vm853_vm5, %v1051_v14 }
  0x88   : > { %856 = vmatprep.subr.msk.bf16.mxu0 %vm855_vm6, %v1051_v14 }
  0x8b   : > { %858 = vmatpush3.bf16.msk.msra.mxu0 %vm857_vm11, %v1051_v14 }
  0x8c   : > { %860 = vmatprep.subr.msk.bf16.mxu0 %vm859_vm12, %v1051_v14 }
  0x8f   : > { %862 = vmatpush3.bf16.msk.msra.mxu0 %vm861_vm15, %v1051_v14 }
  0x92   : > { %533 = vmatmul.mubr.f32.vlgmr.msra.gmra.mrb[0].mxu0 %v330_v21 }
 0x165   : > { %v828_v41 = vpop.f32.mrb[0].mxu0 }
 0x166   : > { %v829_v42 = vpop.f32.mrb[1].mxu0 }
 0x167   : > { %v830_v43 = vadd.f32 %v829_v42, %v828_v41 }
 0x169   : > { %v545_v45 = vmul.f32 %v830_v43, %v543_v39 }
 0x16b   : > { %v548_v46 = vsub.f32 %v545_v45, %v547_v44 }
 0x16d   : > { %v549_v47 = vand.u32 2147483647, %v548_v46 }
 0x16f   : > { %v551_v48 = vmul.f32 0.5, %v549_v47  ;;  %v792_v50 = vadd.f32 -0.5, %v549_v47  ;;  %vm550_vm1 = vcmp.lt.f32.partialorder %v549_v47, 1.0 }
 0x171   : > { %v552_v49 = vmul.f32 %v551_v48, %v549_v47 }
 0x173   : > { %v554_v51 = vsel %vm550_vm1, %v552_v49, %v792_v50 }
 0x174   : > { %v556_v52 = vsel %vm555_vm0, %v554_v51, 0.0 }
 0x175   : > { %557 = vadd.xlane.f32.xlu0 %v556_v52 }
 0x179   : > { %571 = vadd.xlane.f32.xlu0 %v570_v53 }
 0x202   : > { %v558_v54 = vpop.xlane.xlu0 %557 }
 0x203   : > { %v559_v55 = vrot.slane %v558_v54, 4 }
 0x205   : > { %v560_v56 = vadd.f32 %v559_v55, %v558_v54 }
 0x206   : > { %v572_v57 = vpop.xlane.xlu0 %571 }
 0x207   : > { %v561_v58 = vrot.slane %v560_v56, 2  ;;  %v573_v59 = vrot.slane %v572_v57, 4 }
 0x209   : > { %v574_v60 = vadd.f32 %v573_v59, %v572_v57  ;;  %v562_v61 = vadd.f32 %v561_v58, %v560_v56 }
 0x20b   : > { %v575_v62 = vrot.slane %v574_v60, 2  ;;  %v563_v63 = vrot.slane %v562_v61, 1 }
 0x20d   : > { %v576_v0 = vadd.f32 %v575_v62, %v574_v60  ;;  %v564_v1 = vadd.f32 %v563_v63, %v562_v61 }
 0x20f   : > { %863 = vpush %v564_v1  ;;  %v577_v2 = vrot.slane %v576_v0, 1 }
 0x211   : > { %v578_v3 = vadd.f32 %v577_v2, %v576_v0 }
 0x213   : > { %865 = vpush %v578_v3 }
 0x240   : > { %s864_s18 = spop %863 }
 0x241   : > { %v566_v4 = vstv %s864_s18 }
 0x242   : > { %568 = vst.msk [vmem:[%s326_s12] sm:$0x1] %vm567_vm3, %v566_v4 }
 0x244   : > { %s866_s25 = spop %865 }
 0x245   : > { %v580_v5 = vstv %s866_s25 }
 0x246   : > { %581 = vst.msk [vmem:[%s329_s30] sm:$0x1] %vm567_vm3, %v580_v5 }
 0x247 PF: > { %p19_p0 = scmp.ge.s32.totalorder %s1104_s23, 4   ;;  %s1383_s18 = smov %s1038_s19 }
 0x248   : > { %s1384_s19 = smov %s1042_s20  ;;  %s1385_s20 = smov %s1114_s26 }
 0x249   : > { %s1386_s21 = smov %s1104_s23  ;;  %21 = sbr.rel (!%p19_p0) target bundleno = 5 (0x5), region = 115 }
 0x250   :  { %611 = vsyncpa [#allocation3], 1 }
 0x251   :  { %613 = vsyncpa [#allocation3 + $0x1], 1 }
 0x252   :  { %614 = vsyncpa [#allocation5], 1 }
 0x253   :  { %616 = vsyncpa [#allocation5 + $0x1], 1 }

</bundles_post_ra>
